<compile_context>
chip_gen: v7x
topology: tpu7x:2x2x1
jax: 0.10.0
libtpu: 0.0.40
codegen_flags: <defaults>
</compile_context>

<pallas_src>
import jax
import jax.numpy as jnp
from jax import lax
from jax.experimental import pallas as pl
from jax.experimental.pallas import tpu as pltpu


# ----------------------------------------------------------------------------
# Kernel
# ----------------------------------------------------------------------------
def intent_marryup_kernel(xw_ref, len_ref, whh_ref, wlin_h_ref, wlin_t_ref,
                          bias_ref, tag_emb_ref, relw_ref, re_tags_ref,
                          out_ref):
    # xw_ref:      (L, TB, Hp)   pre-projected inputs x @ W_ih, time-major, f32
    # len_ref:     (TB, 1)       int32 sequence lengths
    # whh_ref:     (Hp, Hp)      RNN hidden->hidden weight   (matmul dtype)
    # wlin_h_ref:  (Hp, LBLp)    linear weight, hidden part  (matmul dtype)
    # wlin_t_ref:  (REp, LBLp)   linear weight, tag part     (matmul dtype)
    # bias_ref:    (1, LBLp)     linear bias, f32
    # tag_emb_ref: (LBLp, REp)   tag embedding               (matmul dtype)
    # relw_ref:    (1, LBLp)     per-label re-tag weight, f32
    # re_tags_ref: (TB, LBLp)    f32
    # out_ref:     (TB, LBLp)    f32 (lane-dense store)
    L, TB, Hp = xw_ref.shape
    mm_dtype = whh_ref.dtype
    lengths = len_ref[...]                                   # (TB, 1)
    whh = whh_ref[...]                                       # hoisted load

    def step(t, h_prev):
        h_new = jnp.tanh(
            xw_ref[t]
            + jnp.dot(h_prev.astype(mm_dtype), whh,
                      preferred_element_type=jnp.float32))
        # pack_padded_sequence: freeze hidden once t >= length, so the final
        # carry equals out[b, lengths[b]-1, :]  (= last_hidden).
        return jnp.where(t < lengths, h_new, h_prev)

    last_hidden = lax.fori_loop(0, L, step,
                                jnp.zeros((TB, Hp), jnp.float32),
                                unroll=True)

    # marryup_type == 'all'
    re_tags = re_tags_ref[...]                               # (TB, LBLp)
    tag = jnp.dot(re_tags.astype(mm_dtype), tag_emb_ref[...],
                  preferred_element_type=jnp.float32)        # (TB, REp)
    tag_sum = jnp.maximum(jnp.sum(re_tags, axis=1, keepdims=True),
                          jnp.float32(0.5))                  # (TB, 1)
    tag = tag / tag_sum

    # cat([last_hidden, tag], 1) @ W.T + b == lh @ W_h + tag @ W_t + b
    score = (jnp.dot(last_hidden.astype(mm_dtype), wlin_h_ref[...],
                     preferred_element_type=jnp.float32)
             + jnp.dot(tag.astype(mm_dtype), wlin_t_ref[...],
                       preferred_element_type=jnp.float32)
             + bias_ref[...]
             + re_tags * relw_ref[...])                      # einsum('bl,l->bl')
    out_ref[...] = score


# ----------------------------------------------------------------------------
# Wrapper
# ----------------------------------------------------------------------------
def _round_up(n, m):
    return ((n + m - 1) // m) * m


def _pad_axis(x, target, axis):
    pad = target - x.shape[axis]
    if pad <= 0:
        return x
    widths = [(0, 0)] * x.ndim
    widths[axis] = (0, pad)
    return jnp.pad(x, widths)


def intent_marryup_forward(tokens, lengths, re_tags, params,
                           matmul_dtype=jnp.float32):
    """tokens: (B, L) int32, lengths: (B,) int32 (all >= 1), re_tags: (B, LBL)."""
    emb = params["embedding"].astype(jnp.float32)            # (V, D)
    w_ih = params["w_ih"].astype(jnp.float32)                # (D, H)
    w_hh = params["w_hh"]                                    # (H, H)
    w_lin_h = params["w_lin_h"]                              # (H, LBL)
    w_lin_t = params["w_lin_t"]                              # (RE_D, LBL)
    bias = params["bias"]                                    # (LBL,)
    tag_emb = params["tag_embedding"]                        # (LBL, RE_D)
    re_w = params["re_weight"]                               # (LBL,)

    B, L = tokens.shape
    H = w_hh.shape[0]
    LBL = bias.shape[0]
    RE_D = tag_emb.shape[1]

    LANE, SUB = 128, 8
    Hp = _round_up(H, LANE)              # lane-dense hidden
    LBLp = _round_up(LBL, LANE)          # lane-dense label dim (output store)
    REp = _round_up(RE_D, LANE)
    TB = SUB                             # batch tile (one sublane group)
    Bp = _round_up(max(B, TB), TB)

    # --- hoisted input projection: one (V,D)@(D,Hp) matmul + row gather -----
    # (removes D from the kernel and the per-step x@W_ih from the serial chain)
    w_ih_p = _pad_axis(w_ih, Hp, 1)                                   # (D, Hp)
    table = jnp.dot(emb.astype(matmul_dtype), w_ih_p.astype(matmul_dtype),
                    preferred_element_type=jnp.float32)               # (V, Hp)
    xw = table[tokens]                                                # (B, L, Hp)
    xw = jnp.transpose(xw, (1, 0, 2))                                 # (L, B, Hp)
    xw = _pad_axis(xw, Bp, 1).astype(jnp.float32)                     # (L, Bp, Hp)

    len_col = _pad_axis(lengths.astype(jnp.int32).reshape(B, 1), Bp, 0)
    re_tags_p = _pad_axis(_pad_axis(re_tags.astype(jnp.float32), LBLp, 1),
                          Bp, 0)

    w_hh_p = _pad_axis(_pad_axis(w_hh.astype(matmul_dtype), Hp, 0), Hp, 1)
    w_lh_p = _pad_axis(_pad_axis(w_lin_h.astype(matmul_dtype), Hp, 0), LBLp, 1)
    w_lt_p = _pad_axis(_pad_axis(w_lin_t.astype(matmul_dtype), REp, 0), LBLp, 1)
    tag_emb_p = _pad_axis(_pad_axis(tag_emb.astype(matmul_dtype), LBLp, 0),
                          REp, 1)
    bias_p = _pad_axis(bias.astype(jnp.float32).reshape(1, LBL), LBLp, 1)
    re_w_p = _pad_axis(re_w.astype(jnp.float32).reshape(1, LBL), LBLp, 1)

    mm_bytes = jnp.dtype(matmul_dtype).itemsize
    grid = (Bp // TB,)

    in_specs = [
        pl.BlockSpec((L, TB, Hp), lambda b: (0, b, 0)),     # xw  (batch split)
        pl.BlockSpec((TB, 1), lambda b: (b, 0)),            # lengths
        pl.BlockSpec((Hp, Hp), lambda b: (0, 0)),           # w_hh (replicated)
        pl.BlockSpec((Hp, LBLp), lambda b: (0, 0)),         # w_lin_h
        pl.BlockSpec((REp, LBLp), lambda b: (0, 0)),        # w_lin_t
        pl.BlockSpec((1, LBLp), lambda b: (0, 0)),          # bias
        pl.BlockSpec((LBLp, REp), lambda b: (0, 0)),        # tag_embedding
        pl.BlockSpec((1, LBLp), lambda b: (0, 0)),          # re_weight
        pl.BlockSpec((TB, LBLp), lambda b: (b, 0)),         # re_tags
    ]
    out_spec = pl.BlockSpec((TB, LBLp), lambda b: (b, 0))

    # Advisory cost hint for XLA scheduling around the custom call.
    flops = (2 * L * Bp * Hp * Hp            # recurrence h @ W_hh
             + 2 * Bp * LBLp * REp           # re_tags @ tag_embedding
             + 2 * Bp * Hp * LBLp            # last_hidden @ W_lin_h
             + 2 * Bp * REp * LBLp)          # tag @ W_lin_t
    transcendentals = L * Bp * Hp            # tanh
    bytes_accessed = (xw.size * 4 + len_col.size * 4 + re_tags_p.size * 4
                      + (w_hh_p.size + w_lh_p.size + w_lt_p.size
                         + tag_emb_p.size) * mm_bytes
                      + (bias_p.size + re_w_p.size) * 4
                      + Bp * LBLp * 4)

    # Explicit VMEM budget: per-block bytes, double-buffered, + headroom.
    block_bytes = (L * TB * Hp * 4 + TB * 4 + 2 * TB * LBLp * 4
                   + (Hp * Hp + Hp * LBLp + REp * LBLp + LBLp * REp) * mm_bytes
                   + 2 * LBLp * 4)
    vmem_limit = int(min(100 * 1024 * 1024,
                         max(16 * 1024 * 1024, 2 * block_bytes + (2 << 20))))

    out = pl.pallas_call(
        intent_marryup_kernel,
        out_shape=jax.ShapeDtypeStruct((Bp, LBLp), jnp.float32),
        grid_spec=pltpu.PrefetchScalarGridSpec(
            num_scalar_prefetch=0,
            grid=grid,
            in_specs=in_specs,
            out_specs=out_spec,
        ),
        compiler_params=pltpu.CompilerParams(
            dimension_semantics=("parallel",),   # batch tiles -> megacore
            vmem_limit_bytes=vmem_limit,
        ),
        cost_estimate=pl.CostEstimate(
            flops=int(flops),
            transcendentals=int(transcendentals),
            bytes_accessed=int(bytes_accessed),
        ),
    )(xw, len_col, w_hh_p, w_lh_p, w_lt_p, bias_p, tag_emb_p, re_w_p,
      re_tags_p)

    return out[:B, :LBL]


# ----------------------------------------------------------------------------
# Pure-JAX reference (mirrors the PyTorch forward, rnn='RNN', marryup='all')
# ----------------------------------------------------------------------------
def reference_forward(tokens, lengths, re_tags, params):
    emb = params["embedding"][tokens].astype(jnp.float32)    # (B, L, D)
    B, L, D = emb.shape
    H = params["w_hh"].shape[0]

    def scan_fn(h, x_t):
        h_new = jnp.tanh(x_t @ params["w_ih"] + h @ params["w_hh"])
        return h_new, h_new

    _, outs = lax.scan(scan_fn, jnp.zeros((B, H), jnp.float32),
                       jnp.transpose(emb, (1, 0, 2)))        # (L, B, H)
    last_hidden = outs[lengths - 1, jnp.arange(B)]           # (B, H)

    tag = re_tags @ params["tag_embedding"]
    tag_sum = jnp.maximum(re_tags.sum(axis=1, keepdims=True), 0.5)
    tag = tag / tag_sum
    score = (last_hidden @ params["w_lin_h"] + tag @ params["w_lin_t"]
             + params["bias"] + re_tags * params["re_weight"])
    return score


if __name__ == "__main__":
    # Small, forward-consistent shapes.
    B, L = 2, 8           # batch, seq length
    V, D = 50, 32         # vocab, embed_dim
    H = 32                # rnn_hidden_dim
    LBL = 8               # label_size
    RE_D = 16             # re_tag_dim

    key = jax.random.PRNGKey(0)
    ks = jax.random.split(key, 10)

    params = {
        "embedding":     jax.random.normal(ks[0], (V, D), jnp.float32) * 0.1,
        "w_ih":          jax.random.normal(ks[1], (D, H), jnp.float32) * 0.1,
        "w_hh":          jax.random.normal(ks[2], (H, H), jnp.float32) * 0.1,
        "w_lin_h":       jax.random.normal(ks[3], (H, LBL), jnp.float32) * 0.1,
        "w_lin_t":       jax.random.normal(ks[4], (RE_D, LBL), jnp.float32) * 0.1,
        "bias":          jax.random.normal(ks[5], (LBL,), jnp.float32) * 0.1,
        "tag_embedding": jax.random.normal(ks[6], (LBL, RE_D), jnp.float32),
        "re_weight":     jax.random.normal(ks[7], (LBL,), jnp.float32),
    }

    tokens = jax.random.randint(ks[8], (B, L), 0, V, dtype=jnp.int32)
    lengths = jnp.array([L, 5], dtype=jnp.int32)             # padded batch, all >= 1
    re_tags = jax.random.bernoulli(ks[9], 0.4, (B, LBL)).astype(jnp.float32)

    ref = reference_forward(tokens, lengths, re_tags, params)

    # f32 matmul path: tight match against the PyTorch-equivalent reference.
    score = intent_marryup_forward(tokens, lengths, re_tags, params,
                                   matmul_dtype=jnp.float32)
    score = jax.block_until_ready(score)
    assert score.shape == (B, LBL)
    assert jnp.allclose(score, ref, atol=1e-4, rtol=1e-4), (score, ref)

    # bf16 matmul operands (f32 accumulation / f32 tanh): looser tolerance.
    score_bf16 = intent_marryup_forward(tokens, lengths, re_tags, params,
                                        matmul_dtype=jnp.bfloat16)
    score_bf16 = jax.block_until_ready(score_bf16)
    assert jnp.allclose(score_bf16, ref, atol=3e-2, rtol=3e-2), (score_bf16, ref)

    print("KERNEL_OK")
</pallas_src>

<mosaic_0001>
module attributes {stable_mosaic.version = 11 : i64} {
  func.func @intent_marryup_kernel(%arg0: i32, %arg1: memref<8x8x128xf32, #tpu.memory_space<vmem>>, %arg2: memref<8x1xi32, #tpu.memory_space<vmem>>, %arg3: memref<128x128xf32, #tpu.memory_space<vmem>>, %arg4: memref<128x128xf32, #tpu.memory_space<vmem>>, %arg5: memref<128x128xf32, #tpu.memory_space<vmem>>, %arg6: memref<1x128xf32, #tpu.memory_space<vmem>>, %arg7: memref<128x128xf32, #tpu.memory_space<vmem>>, %arg8: memref<1x128xf32, #tpu.memory_space<vmem>>, %arg9: memref<8x128xf32, #tpu.memory_space<vmem>>, %arg10: memref<8x128xf32, #tpu.memory_space<vmem>>) attributes {dimension_semantics = [#tpu.dimension_semantics<parallel>], iteration_bounds = array<i64: 1>, scalar_prefetch = 0 : i64, scratch_operands = 0 : i64, tpu.core_type = #tpu.core_type<tc>, window_params = [{transform_indices = @transform_0, window_bounds = array<i64: 8, 8, 128>}, {transform_indices = @transform_1, window_bounds = array<i64: 8, 1>}, {pipeline_mode = #tpu.pipeline_mode<synchronous>, transform_indices = @transform_2, window_bounds = array<i64: 128, 128>}, {pipeline_mode = #tpu.pipeline_mode<synchronous>, transform_indices = @transform_3, window_bounds = array<i64: 128, 128>}, {pipeline_mode = #tpu.pipeline_mode<synchronous>, transform_indices = @transform_4, window_bounds = array<i64: 128, 128>}, {pipeline_mode = #tpu.pipeline_mode<synchronous>, transform_indices = @transform_5, window_bounds = array<i64: 1, 128>}, {pipeline_mode = #tpu.pipeline_mode<synchronous>, transform_indices = @transform_6, window_bounds = array<i64: 128, 128>}, {pipeline_mode = #tpu.pipeline_mode<synchronous>, transform_indices = @transform_7, window_bounds = array<i64: 1, 128>}, {transform_indices = @transform_8, window_bounds = array<i64: 8, 128>}, {transform_indices = @transform_9, window_bounds = array<i64: 8, 128>}]} {
    %c0 = arith.constant 0 : index
    %c0_0 = arith.constant 0 : index
    %0 = vector.load %arg2[%c0, %c0_0] : memref<8x1xi32, #tpu.memory_space<vmem>>, vector<8x1xi32>
    %c0_1 = arith.constant 0 : index
    %c0_2 = arith.constant 0 : index
    %1 = vector.load %arg3[%c0_1, %c0_2] : memref<128x128xf32, #tpu.memory_space<vmem>>, vector<128x128xf32>
    %cst = arith.constant 0.000000e+00 : f32
    %2 = vector.broadcast %cst : f32 to vector<8x128xf32>
    %c0_i32 = arith.constant 0 : i32
    %3 = arith.index_cast %c0_i32 : i32 to index
    %c0_3 = arith.constant 0 : index
    %c0_4 = arith.constant 0 : index
    %4 = vector.load %arg1[%3, %c0_3, %c0_4] : memref<8x8x128xf32, #tpu.memory_space<vmem>>, vector<1x8x128xf32>
    %5 = vector.shape_cast %4 : vector<1x8x128xf32> to vector<8x128xf32>
    %cst_5 = arith.constant dense<0.000000e+00> : vector<8x128xf32>
    %6 = tpu.matmul %2, %1, %cst_5 {dimension_numbers = #tpu.dot_dimension_numbers<[1], [0], [0], [1], [0, 0, 1, 1], [], []>} : vector<8x128xf32>, vector<128x128xf32>, vector<8x128xf32> -> vector<8x128xf32>
    %7 = arith.addf %5, %6 : vector<8x128xf32>
    %8 = math.tanh %7 : vector<8x128xf32>
    %9 = vector.broadcast %c0_i32 : i32 to vector<8x1xi32>
    %10 = arith.cmpi slt, %9, %0 : vector<8x1xi32>
    %11 = vector.shape_cast %10 : vector<8x1xi1> to vector<8x1xi1>
    %12 = vector.broadcast %11 : vector<8x1xi1> to vector<8x128xi1>
    %13 = arith.select %12, %8, %2 : vector<8x128xi1>, vector<8x128xf32>
    %c1_i32 = arith.constant 1 : i32
    %14 = arith.index_cast %c1_i32 : i32 to index
    %c0_6 = arith.constant 0 : index
    %c0_7 = arith.constant 0 : index
    %15 = vector.load %arg1[%14, %c0_6, %c0_7] : memref<8x8x128xf32, #tpu.memory_space<vmem>>, vector<1x8x128xf32>
    %16 = vector.shape_cast %15 : vector<1x8x128xf32> to vector<8x128xf32>
    %cst_8 = arith.constant dense<0.000000e+00> : vector<8x128xf32>
    %17 = tpu.matmul %13, %1, %cst_8 {dimension_numbers = #tpu.dot_dimension_numbers<[1], [0], [0], [1], [0, 0, 1, 1], [], []>} : vector<8x128xf32>, vector<128x128xf32>, vector<8x128xf32> -> vector<8x128xf32>
    %18 = arith.addf %16, %17 : vector<8x128xf32>
    %19 = math.tanh %18 : vector<8x128xf32>
    %20 = vector.broadcast %c1_i32 : i32 to vector<8x1xi32>
    %21 = arith.cmpi slt, %20, %0 : vector<8x1xi32>
    %22 = vector.shape_cast %21 : vector<8x1xi1> to vector<8x1xi1>
    %23 = vector.broadcast %22 : vector<8x1xi1> to vector<8x128xi1>
    %24 = arith.select %23, %19, %13 : vector<8x128xi1>, vector<8x128xf32>
    %c2_i32 = arith.constant 2 : i32
    %25 = arith.index_cast %c2_i32 : i32 to index
    %c0_9 = arith.constant 0 : index
    %c0_10 = arith.constant 0 : index
    %26 = vector.load %arg1[%25, %c0_9, %c0_10] : memref<8x8x128xf32, #tpu.memory_space<vmem>>, vector<1x8x128xf32>
    %27 = vector.shape_cast %26 : vector<1x8x128xf32> to vector<8x128xf32>
    %cst_11 = arith.constant dense<0.000000e+00> : vector<8x128xf32>
    %28 = tpu.matmul %24, %1, %cst_11 {dimension_numbers = #tpu.dot_dimension_numbers<[1], [0], [0], [1], [0, 0, 1, 1], [], []>} : vector<8x128xf32>, vector<128x128xf32>, vector<8x128xf32> -> vector<8x128xf32>
    %29 = arith.addf %27, %28 : vector<8x128xf32>
    %30 = math.tanh %29 : vector<8x128xf32>
    %31 = vector.broadcast %c2_i32 : i32 to vector<8x1xi32>
    %32 = arith.cmpi slt, %31, %0 : vector<8x1xi32>
    %33 = vector.shape_cast %32 : vector<8x1xi1> to vector<8x1xi1>
    %34 = vector.broadcast %33 : vector<8x1xi1> to vector<8x128xi1>
    %35 = arith.select %34, %30, %24 : vector<8x128xi1>, vector<8x128xf32>
    %c3_i32 = arith.constant 3 : i32
    %36 = arith.index_cast %c3_i32 : i32 to index
    %c0_12 = arith.constant 0 : index
    %c0_13 = arith.constant 0 : index
    %37 = vector.load %arg1[%36, %c0_12, %c0_13] : memref<8x8x128xf32, #tpu.memory_space<vmem>>, vector<1x8x128xf32>
    %38 = vector.shape_cast %37 : vector<1x8x128xf32> to vector<8x128xf32>
    %cst_14 = arith.constant dense<0.000000e+00> : vector<8x128xf32>
    %39 = tpu.matmul %35, %1, %cst_14 {dimension_numbers = #tpu.dot_dimension_numbers<[1], [0], [0], [1], [0, 0, 1, 1], [], []>} : vector<8x128xf32>, vector<128x128xf32>, vector<8x128xf32> -> vector<8x128xf32>
    %40 = arith.addf %38, %39 : vector<8x128xf32>
    %41 = math.tanh %40 : vector<8x128xf32>
    %42 = vector.broadcast %c3_i32 : i32 to vector<8x1xi32>
    %43 = arith.cmpi slt, %42, %0 : vector<8x1xi32>
    %44 = vector.shape_cast %43 : vector<8x1xi1> to vector<8x1xi1>
    %45 = vector.broadcast %44 : vector<8x1xi1> to vector<8x128xi1>
    %46 = arith.select %45, %41, %35 : vector<8x128xi1>, vector<8x128xf32>
    %c4_i32 = arith.constant 4 : i32
    %47 = arith.index_cast %c4_i32 : i32 to index
    %c0_15 = arith.constant 0 : index
    %c0_16 = arith.constant 0 : index
    %48 = vector.load %arg1[%47, %c0_15, %c0_16] : memref<8x8x128xf32, #tpu.memory_space<vmem>>, vector<1x8x128xf32>
    %49 = vector.shape_cast %48 : vector<1x8x128xf32> to vector<8x128xf32>
    %cst_17 = arith.constant dense<0.000000e+00> : vector<8x128xf32>
    %50 = tpu.matmul %46, %1, %cst_17 {dimension_numbers = #tpu.dot_dimension_numbers<[1], [0], [0], [1], [0, 0, 1, 1], [], []>} : vector<8x128xf32>, vector<128x128xf32>, vector<8x128xf32> -> vector<8x128xf32>
    %51 = arith.addf %49, %50 : vector<8x128xf32>
    %52 = math.tanh %51 : vector<8x128xf32>
    %53 = vector.broadcast %c4_i32 : i32 to vector<8x1xi32>
    %54 = arith.cmpi slt, %53, %0 : vector<8x1xi32>
    %55 = vector.shape_cast %54 : vector<8x1xi1> to vector<8x1xi1>
    %56 = vector.broadcast %55 : vector<8x1xi1> to vector<8x128xi1>
    %57 = arith.select %56, %52, %46 : vector<8x128xi1>, vector<8x128xf32>
    %c5_i32 = arith.constant 5 : i32
    %58 = arith.index_cast %c5_i32 : i32 to index
    %c0_18 = arith.constant 0 : index
    %c0_19 = arith.constant 0 : index
    %59 = vector.load %arg1[%58, %c0_18, %c0_19] : memref<8x8x128xf32, #tpu.memory_space<vmem>>, vector<1x8x128xf32>
    %60 = vector.shape_cast %59 : vector<1x8x128xf32> to vector<8x128xf32>
    %cst_20 = arith.constant dense<0.000000e+00> : vector<8x128xf32>
    %61 = tpu.matmul %57, %1, %cst_20 {dimension_numbers = #tpu.dot_dimension_numbers<[1], [0], [0], [1], [0, 0, 1, 1], [], []>} : vector<8x128xf32>, vector<128x128xf32>, vector<8x128xf32> -> vector<8x128xf32>
    %62 = arith.addf %60, %61 : vector<8x128xf32>
    %63 = math.tanh %62 : vector<8x128xf32>
    %64 = vector.broadcast %c5_i32 : i32 to vector<8x1xi32>
    %65 = arith.cmpi slt, %64, %0 : vector<8x1xi32>
    %66 = vector.shape_cast %65 : vector<8x1xi1> to vector<8x1xi1>
    %67 = vector.broadcast %66 : vector<8x1xi1> to vector<8x128xi1>
    %68 = arith.select %67, %63, %57 : vector<8x128xi1>, vector<8x128xf32>
    %c6_i32 = arith.constant 6 : i32
    %69 = arith.index_cast %c6_i32 : i32 to index
    %c0_21 = arith.constant 0 : index
    %c0_22 = arith.constant 0 : index
    %70 = vector.load %arg1[%69, %c0_21, %c0_22] : memref<8x8x128xf32, #tpu.memory_space<vmem>>, vector<1x8x128xf32>
    %71 = vector.shape_cast %70 : vector<1x8x128xf32> to vector<8x128xf32>
    %cst_23 = arith.constant dense<0.000000e+00> : vector<8x128xf32>
    %72 = tpu.matmul %68, %1, %cst_23 {dimension_numbers = #tpu.dot_dimension_numbers<[1], [0], [0], [1], [0, 0, 1, 1], [], []>} : vector<8x128xf32>, vector<128x128xf32>, vector<8x128xf32> -> vector<8x128xf32>
    %73 = arith.addf %71, %72 : vector<8x128xf32>
    %74 = math.tanh %73 : vector<8x128xf32>
    %75 = vector.broadcast %c6_i32 : i32 to vector<8x1xi32>
    %76 = arith.cmpi slt, %75, %0 : vector<8x1xi32>
    %77 = vector.shape_cast %76 : vector<8x1xi1> to vector<8x1xi1>
    %78 = vector.broadcast %77 : vector<8x1xi1> to vector<8x128xi1>
    %79 = arith.select %78, %74, %68 : vector<8x128xi1>, vector<8x128xf32>
    %c7_i32 = arith.constant 7 : i32
    %80 = arith.index_cast %c7_i32 : i32 to index
    %c0_24 = arith.constant 0 : index
    %c0_25 = arith.constant 0 : index
    %81 = vector.load %arg1[%80, %c0_24, %c0_25] : memref<8x8x128xf32, #tpu.memory_space<vmem>>, vector<1x8x128xf32>
    %82 = vector.shape_cast %81 : vector<1x8x128xf32> to vector<8x128xf32>
    %cst_26 = arith.constant dense<0.000000e+00> : vector<8x128xf32>
    %83 = tpu.matmul %79, %1, %cst_26 {dimension_numbers = #tpu.dot_dimension_numbers<[1], [0], [0], [1], [0, 0, 1, 1], [], []>} : vector<8x128xf32>, vector<128x128xf32>, vector<8x128xf32> -> vector<8x128xf32>
    %84 = arith.addf %82, %83 : vector<8x128xf32>
    %85 = math.tanh %84 : vector<8x128xf32>
    %86 = vector.broadcast %c7_i32 : i32 to vector<8x1xi32>
    %87 = arith.cmpi slt, %86, %0 : vector<8x1xi32>
    %88 = vector.shape_cast %87 : vector<8x1xi1> to vector<8x1xi1>
    %89 = vector.broadcast %88 : vector<8x1xi1> to vector<8x128xi1>
    %90 = arith.select %89, %85, %79 : vector<8x128xi1>, vector<8x128xf32>
    %c8_i32 = arith.constant 8 : i32
    %c0_27 = arith.constant 0 : index
    %c0_28 = arith.constant 0 : index
    %91 = vector.load %arg9[%c0_27, %c0_28] : memref<8x128xf32, #tpu.memory_space<vmem>>, vector<8x128xf32>
    %c0_29 = arith.constant 0 : index
    %c0_30 = arith.constant 0 : index
    %92 = vector.load %arg7[%c0_29, %c0_30] : memref<128x128xf32, #tpu.memory_space<vmem>>, vector<128x128xf32>
    %cst_31 = arith.constant dense<0.000000e+00> : vector<8x128xf32>
    %93 = tpu.matmul %91, %92, %cst_31 {dimension_numbers = #tpu.dot_dimension_numbers<[1], [0], [0], [1], [0, 0, 1, 1], [], []>} : vector<8x128xf32>, vector<128x128xf32>, vector<8x128xf32> -> vector<8x128xf32>
    %cst_32 = arith.constant dense<0.000000e+00> : vector<8xf32>
    %94 = vector.multi_reduction <add>, %91, %cst_32 [1] : vector<8x128xf32> to vector<8xf32>
    %95 = vector.shape_cast %94 : vector<8xf32> to vector<8x1xf32>
    %cst_33 = arith.constant 5.000000e-01 : f32
    %96 = vector.broadcast %cst_33 : f32 to vector<8x1xf32>
    %97 = arith.maximumf %95, %96 : vector<8x1xf32>
    %98 = vector.broadcast %97 : vector<8x1xf32> to vector<8x128xf32>
    %99 = arith.divf %93, %98 : vector<8x128xf32>
    %c0_34 = arith.constant 0 : index
    %c0_35 = arith.constant 0 : index
    %100 = vector.load %arg4[%c0_34, %c0_35] : memref<128x128xf32, #tpu.memory_space<vmem>>, vector<128x128xf32>
    %cst_36 = arith.constant dense<0.000000e+00> : vector<8x128xf32>
    %101 = tpu.matmul %90, %100, %cst_36 {dimension_numbers = #tpu.dot_dimension_numbers<[1], [0], [0], [1], [0, 0, 1, 1], [], []>} : vector<8x128xf32>, vector<128x128xf32>, vector<8x128xf32> -> vector<8x128xf32>
    %c0_37 = arith.constant 0 : index
    %c0_38 = arith.constant 0 : index
    %102 = vector.load %arg5[%c0_37, %c0_38] : memref<128x128xf32, #tpu.memory_space<vmem>>, vector<128x128xf32>
    %cst_39 = arith.constant dense<0.000000e+00> : vector<8x128xf32>
    %103 = tpu.matmul %99, %102, %cst_39 {dimension_numbers = #tpu.dot_dimension_numbers<[1], [0], [0], [1], [0, 0, 1, 1], [], []>} : vector<8x128xf32>, vector<128x128xf32>, vector<8x128xf32> -> vector<8x128xf32>
    %104 = arith.addf %101, %103 : vector<8x128xf32>
    %c0_40 = arith.constant 0 : index
    %c0_41 = arith.constant 0 : index
    %105 = vector.load %arg6[%c0_40, %c0_41] : memref<1x128xf32, #tpu.memory_space<vmem>>, vector<1x128xf32>
    %106 = vector.broadcast %105 : vector<1x128xf32> to vector<8x128xf32>
    %107 = arith.addf %104, %106 : vector<8x128xf32>
    %c0_42 = arith.constant 0 : index
    %c0_43 = arith.constant 0 : index
    %108 = vector.load %arg8[%c0_42, %c0_43] : memref<1x128xf32, #tpu.memory_space<vmem>>, vector<1x128xf32>
    %109 = vector.broadcast %108 : vector<1x128xf32> to vector<8x128xf32>
    %110 = arith.mulf %91, %109 : vector<8x128xf32>
    %111 = arith.addf %107, %110 : vector<8x128xf32>
    %c0_44 = arith.constant 0 : index
    %c0_45 = arith.constant 0 : index
    %112 = vector.load %arg10[%c0_44, %c0_45] : memref<8x128xf32, #tpu.memory_space<vmem>>, vector<8x128xf32>
    tpu.vector_store %arg10[%c0_44, %c0_45], %111 {strides = array<i32>} : memref<8x128xf32, #tpu.memory_space<vmem>>, vector<8x128xf32>,
    return
  }
  func.func @transform_0(%arg0: i32) -> (i32, i32, i32) {
    %c0_i32 = arith.constant 0 : i32
    %c0_i32_0 = arith.constant 0 : i32
    %c0_i32_1 = arith.constant 0 : i32
    return %c0_i32, %arg0, %c0_i32_0 : i32, i32, i32
  }
  func.func @transform_1(%arg0: i32) -> (i32, i32) {
    %c0_i32 = arith.constant 0 : i32
    %c0_i32_0 = arith.constant 0 : i32
    return %arg0, %c0_i32 : i32, i32
  }
  func.func @transform_2(%arg0: i32) -> (i32, i32) {
    %c0_i32 = arith.constant 0 : i32
    %c0_i32_0 = arith.constant 0 : i32
    %c0_i32_1 = arith.constant 0 : i32
    return %c0_i32, %c0_i32_0 : i32, i32
  }
  func.func @transform_3(%arg0: i32) -> (i32, i32) {
    %c0_i32 = arith.constant 0 : i32
    %c0_i32_0 = arith.constant 0 : i32
    %c0_i32_1 = arith.constant 0 : i32
    return %c0_i32, %c0_i32_0 : i32, i32
  }
  func.func @transform_4(%arg0: i32) -> (i32, i32) {
    %c0_i32 = arith.constant 0 : i32
    %c0_i32_0 = arith.constant 0 : i32
    %c0_i32_1 = arith.constant 0 : i32
    return %c0_i32, %c0_i32_0 : i32, i32
  }
  func.func @transform_5(%arg0: i32) -> (i32, i32) {
    %c0_i32 = arith.constant 0 : i32
    %c0_i32_0 = arith.constant 0 : i32
    %c0_i32_1 = arith.constant 0 : i32
    return %c0_i32, %c0_i32_0 : i32, i32
  }
  func.func @transform_6(%arg0: i32) -> (i32, i32) {
    %c0_i32 = arith.constant 0 : i32
    %c0_i32_0 = arith.constant 0 : i32
    %c0_i32_1 = arith.constant 0 : i32
    return %c0_i32, %c0_i32_0 : i32, i32
  }
  func.func @transform_7(%arg0: i32) -> (i32, i32) {
    %c0_i32 = arith.constant 0 : i32
    %c0_i32_0 = arith.constant 0 : i32
    %c0_i32_1 = arith.constant 0 : i32
    return %c0_i32, %c0_i32_0 : i32, i32
  }
  func.func @transform_8(%arg0: i32) -> (i32, i32) {
    %c0_i32 = arith.constant 0 : i32
    %c0_i32_0 = arith.constant 0 : i32
    return %arg0, %c0_i32 : i32, i32
  }
  func.func @transform_9(%arg0: i32) -> (i32, i32) {
    %c0_i32 = arith.constant 0 : i32
    %c0_i32_0 = arith.constant 0 : i32
    return %arg0, %c0_i32 : i32, i32
  }
}

</mosaic_0001>

<bundles_post_ra>
// kernel: tpu_custom_call.1
= control target key start
LH: loop header
LB: loop body
LE: loop exit
PB: predicated region body
PF: predicated region fallthrough
CT: control target
= control target key end

     0   :  { %14 = vsyncpa [#allocation3], 0  ;;  %s2474_s0 = inlined_call_operand.hbm [shape: f32[8,8,128], index: 0, kind: input, shape index: {}]   ;;  %s2475_s1 = inlined_call_operand.vmem [shape: s32[8,1], index: 1, kind: input, shape index: {}]   ;;  %s2476_s2 = inlined_call_operand.hbm [shape: f32[128,128], index: 2, kind: input, shape index: {}]   ;;  %s2477_s3 = inlined_call_operand.hbm [shape: f32[128,128], index: 3, kind: input, shape index: {}]   ;;  %s2478_s4 = inlined_call_operand.hbm [shape: f32[128,128], index: 4, kind: input, shape index: {}]   ;;  %s2479_s5 = inlined_call_operand.vmem [shape: f32[1,128], index: 5, kind: input, shape index: {}]   ;;  %s2480_s6 = inlined_call_operand.hbm [shape: f32[128,128], index: 6, kind: input, shape index: {}]   ;;  %s2481_s7 = inlined_call_operand.vmem [shape: f32[1,128], index: 7, kind: input, shape index: {}]   ;;  %s2482_s8 = inlined_call_operand.vmem [shape: f32[8,128], index: 8, kind: input, shape index: {}]   ;;  %s2483_s9 = inlined_call_operand.hbm [shape: f32[8,128], index: 9, kind: output, shape index: {}]  }
   0x1   :  { %15 = vsyncpa [#allocation6], 0 }
   0x2   :  { %16 = vsyncpa [#allocation9], 0 }
   0x3   :  { %17 = vsyncpa [#allocation4], 0  ;;  %s2075_s30 = smov [#allocation5]   ;;  %s2076_s11 = smov [#allocation8]  }
   0x4   :  { %s37_s10 = sshll.u32 %s2075_s30, 4  ;;  %s61_s12 = sshll.u32 %s2076_s11, 4  ;;  %s38_s10 = int_to_ptr.vmem [resolvable:$true] %s37_s10  ;;  %s2137_s12 = int_to_ptr.vmem [resolvable:$true] %s61_s12 }
   0x5   :  { %s1935_s15 = scalar_lea.hbm %s2476_s2, 2048 }
   0x6   :  { %p1936_p0 = scmp.ne.s32.totalorder %s2476_s2, %s1935_s15  ;;  %p1939_p1 = scmp.lt.u32.totalorder %s1935_s15, %s2476_s2 }
   0x8   :  { %p1941_p2 = pnand %p1939_p1, %p1936_p0 }
   0xa   :  { %1944 = shalt.err (!%p1941_p2)
}
   0xb   :  { %s1945_s20 = scalar_lea.vmem %s38_s10, 2048  ;;  %p1950_p4 = scmp.lt.s32.totalorder %s38_s10, %s38_s10 }
   0xc   :  { %p1946_p3 = scmp.ne.s32.totalorder %s38_s10, %s1945_s20  ;;  %p1951_p5 = scmp.lt.s32.totalorder %s1945_s20, %s1945_s20 }
   0xe   :  { %p1952_p6 = por %p1951_p5, %p1950_p4 }
  0x10   :  { %p1953_p7 = pnand %p1952_p6, %p1946_p3 }
  0x12   :  { %1956 = shalt.err (!%p1953_p7)
}
  0x13   :  { %s2077_s21 = smov 128   ;;  %s2078_s22 = smov 8  }
  0x14   :  { %43 = dma.hbm_to_vmem [thread:$0]  %s2476_s2, 2048, %s38_s10, [#allocation6], %s2077_s21, %s2077_s21, %s2078_s22  }
  0x15   :  { %s1957_s27 = scalar_lea.hbm %s2478_s4, 2048 }
  0x16   :  { %p1958_p8 = scmp.ne.s32.totalorder %s2478_s4, %s1957_s27  ;;  %p1961_p9 = scmp.lt.u32.totalorder %s1957_s27, %s2478_s4 }
  0x18   :  { %p1963_p10 = pnand %p1961_p9, %p1958_p8 }
  0x1a   :  { %1966 = shalt.err (!%p1963_p10)
}
  0x1b   :  { %s1967_s13 = scalar_lea.vmem %s2137_s12, 2048  ;;  %p1972_p12 = scmp.lt.s32.totalorder %s2137_s12, %s2137_s12 }
  0x1c   :  { %p1968_p11 = scmp.ne.s32.totalorder %s2137_s12, %s1967_s13  ;;  %p1973_p13 = scmp.lt.s32.totalorder %s1967_s13, %s1967_s13 }
  0x1e   :  { %p1974_p0 = por %p1973_p13, %p1972_p12 }
  0x20   :  { %p1975_p1 = pnand %p1974_p0, %p1968_p11 }
  0x22   :  { %1978 = shalt.err (!%p1975_p1)
}
  0x23   :  { %67 = dma.hbm_to_vmem [thread:$0]  %s2478_s4, 2048, %s2137_s12, [#allocation9], %s2077_s21, %s2077_s21, %s2078_s22  }
  0x24   :  { %s2079_s14 = smov [#allocation2]   ;;  %s2080_s16 = smov [#allocation7]  }
  0x25   :  { %s23_s15 = sshll.u32 %s2079_s14, 4  ;;  %s49_s17 = sshll.u32 %s2080_s16, 4  ;;  %s24_s15 = int_to_ptr.vmem [resolvable:$true] %s23_s15  ;;  %s2174_s17 = int_to_ptr.vmem [resolvable:$true] %s49_s17 }
  0x26   :  { %s1979_s20 = scalar_lea.hbm %s2474_s0, 1024 }
  0x27   :  { %p1980_p2 = scmp.ne.s32.totalorder %s2474_s0, %s1979_s20  ;;  %p1983_p3 = scmp.lt.u32.totalorder %s1979_s20, %s2474_s0 }
  0x29   :  { %p1985_p4 = pnand %p1983_p3, %p1980_p2 }
  0x2b   :  { %1988 = shalt.err (!%p1985_p4)
}
  0x2c   :  { %s1989_s4 = scalar_lea.vmem %s24_s15, 1024  ;;  %p1994_p6 = scmp.lt.s32.totalorder %s24_s15, %s24_s15 }
  0x2d   :  { %p1990_p5 = scmp.ne.s32.totalorder %s24_s15, %s1989_s4  ;;  %p1995_p7 = scmp.lt.s32.totalorder %s1989_s4, %s1989_s4 }
  0x2f   :  { %p1996_p8 = por %p1995_p7, %p1994_p6 }
  0x31   :  { %p1997_p9 = pnand %p1996_p8, %p1990_p5 }
  0x33   :  { %2000 = shalt.err (!%p1997_p9)
}
  0x34   :  { %29 = dma.hbm_to_vmem [thread:$0]  %s2474_s0, 1024, %s24_s15, [#allocation3], %s2077_s21, %s2077_s21, %s2078_s22  }
  0x35   :  { %s2001_s30 = scalar_lea.hbm %s2477_s3, 2048 }
  0x36   :  { %p2002_p10 = scmp.ne.s32.totalorder %s2477_s3, %s2001_s30  ;;  %p2005_p11 = scmp.lt.u32.totalorder %s2001_s30, %s2477_s3 }
  0x38   :  { %p2007_p12 = pnand %p2005_p11, %p2002_p10 }
  0x3a   :  { %2010 = shalt.err (!%p2007_p12)
}
  0x3b   :  { %s2011_s14 = scalar_lea.vmem %s2174_s17, 2048  ;;  %p2016_p0 = scmp.lt.s32.totalorder %s2174_s17, %s2174_s17 }
  0x3c   :  { %p2012_p13 = scmp.ne.s32.totalorder %s2174_s17, %s2011_s14  ;;  %p2017_p1 = scmp.lt.s32.totalorder %s2011_s14, %s2011_s14 }
  0x3e   :  { %p2018_p2 = por %p2017_p1, %p2016_p0 }
  0x40   :  { %p2019_p3 = pnand %p2018_p2, %p2012_p13 }
  0x42   :  { %2022 = shalt.err (!%p2019_p3)
}
  0x43   :  { %55 = dma.hbm_to_vmem [thread:$0]  %s2477_s3, 2048, %s2174_s17, [#allocation6], %s2077_s21, %s2077_s21, %s2078_s22  }
  0x44   :  { %s2081_s16 = smov [#allocation10]   ;;  %s2023_s23 = scalar_lea.hbm %s2480_s6, 2048 }
  0x45   :  { %s75_s18 = sshll.u32 %s2081_s16, 4  ;;  %p2024_p4 = scmp.ne.s32.totalorder %s2480_s6, %s2023_s23  ;;  %s76_s18 = int_to_ptr.vmem [resolvable:$true] %s75_s18 }
  0x46   :  { %p2027_p5 = scmp.lt.u32.totalorder %s2023_s23, %s2480_s6 }
  0x48   :  { %p2029_p6 = pnand %p2027_p5, %p2024_p4 }
  0x4a   :  { %2032 = shalt.err (!%p2029_p6)
}
  0x4b   :  { %s2033_s12 = scalar_lea.vmem %s76_s18, 2048  ;;  %p2038_p8 = scmp.lt.s32.totalorder %s76_s18, %s76_s18 }
  0x4c   :  { %p2034_p7 = scmp.ne.s32.totalorder %s76_s18, %s2033_s12  ;;  %p2039_p9 = scmp.lt.s32.totalorder %s2033_s12, %s2033_s12 }
  0x4e   :  { %p2040_p10 = por %p2039_p9, %p2038_p8 }
  0x50   :  { %p2041_p11 = pnand %p2040_p10, %p2034_p7 }
  0x52   :  { %2044 = shalt.err (!%p2041_p11)
}
  0x53   :  { %81 = dma.hbm_to_vmem [thread:$0]  %s2480_s6, 2048, %s76_s18, [#allocation9], %s2077_s21, %s2077_s21, %s2078_s22  }
  0x54   :  { %2067 = dma.done.wait [#allocation3], 1024  }
  0x55   :  { %2068 = vsyncadd [#allocation3], 4294966272 }
  0x56   :  { %2069 = dma.done.wait [#allocation6], 4096  }
  0x57   :  { %2070 = vsyncadd [#allocation6], 4294963200 }
  0x58   :  { %2071 = dma.done.wait [#allocation9], 4096  }
  0x59   :  { %2072 = vsyncadd [#allocation9], 4294963200  ;;  %v2082_v0 = vmov 0.0|0.0   ;;  %vm2083_vm0 = vmmov 0   ;;  %v2084_v1 = vmov 0.0   ;;  %v2085_v2 = vmov 0  }
  0x5a   :  { %1639 = vmatprep.subr.bf16.mxu0 %v2082_v0  ;;  %1286 = vmatprep.mubr.msk.f32.mxu0 %vm2083_vm0, %v2084_v1  ;;  %v102_v3 = vld [vmem:[#allocation5] sm:$0xff]  ;;  %v103_v4 = vld [vmem:[#allocation5 + $0x8] sm:$0xff]  ;;  %v104_v5 = vld [vmem:[#allocation5 + $0x10] sm:$0xff]  ;;  %s2086_s30 = smov [#allocation11]  }
  0x5b   :  { %1915 = vset.pattern.permute.xlu0 %v2085_v2  ;;  %1663 = vmatprep.subr.bf16.mxu1 %v2082_v0  ;;  %v2234_v6 = vpack.c.bf16 %v103_v4, %v102_v3  ;;  %v105_v7 = vld [vmem:[#allocation5 + $0x18] sm:$0xff]  ;;  %v106_v9 = vld [vmem:[#allocation5 + $0x20] sm:$0xff]  ;;  %v107_v10 = vld [vmem:[#allocation5 + $0x28] sm:$0xff]  ;;  %s1053_s11 = sshll.u32 %s2086_s30, 4  ;;  %s1054_s11 = int_to_ptr.vmem [resolvable:$true] %s1053_s11 }
  0x5c   :  { %1321 = vmatprep.mubr.msk.f32.mxu1 %vm2083_vm0, %v2084_v1  ;;  %1916 = vset.pattern.permute.xlu1 %v2085_v2  ;;  %v2237_v8 = vpack.c.bf16 %v105_v7, %v104_v5  ;;  %v2245_v11 = vld [vmem:[%s2475_s1] sm:$0xff]  ;;  %v2250_v12 = vpack.c.bf16 %v107_v10, %v106_v9  ;;  %v108_v14 = vld [vmem:[#allocation5 + $0x30] sm:$0xff]  ;;  %v109_v15 = vld [vmem:[#allocation5 + $0x38] sm:$0xff]  ;;  %s2045_s13 = scalar_lea.vmem %s1054_s11, 128  ;;  %p2050_p13 = scmp.lt.s32.totalorder %s1054_s11, %s1054_s11 }
  0x5d   :  { %1641 = vmatpush3.bf16.msra.mxu0 %v2234_v6  ;;  %1665 = vmatpush3.bf16.msra.mxu1 %v2234_v6  ;;  %vm191_vm1 = vcmp.gt.s32.totalorder %v2245_v11, 0  ;;  %vm272_vm2 = vcmp.gt.s32.totalorder %v2245_v11, 1  ;;  %vm515_vm3 = vcmp.gt.s32.totalorder %v2245_v11, 4  ;;  %v2259_v17 = vpack.c.bf16 %v109_v15, %v108_v14  ;;  %v110_v18 = vld [vmem:[#allocation5 + $0x40] sm:$0xff]  ;;  %v111_v19 = vld [vmem:[#allocation5 + $0x48] sm:$0xff]  ;;  %v112_v22 = vld [vmem:[#allocation5 + $0x50] sm:$0xff]  ;;  %p2046_p12 = scmp.ne.s32.totalorder %s1054_s11, %s2045_s13  ;;  %p2051_p0 = scmp.lt.s32.totalorder %s2045_s13, %s2045_s13 }
  0x5e   :  { %1642 = vmatprep.subr.bf16.mxu0 %v2082_v0  ;;  %1666 = vmatprep.subr.bf16.mxu1 %v2082_v0  ;;  %v192_v13 = vsel %vm191_vm1, 1, %v2085_v2  ;;  %v273_v16 = vsel %vm272_vm2, 1, %v2085_v2  ;;  %v516_v20 = vsel %vm515_vm3, 1, %v2085_v2  ;;  %vm677_vm4 = vcmp.gt.s32.totalorder %v2245_v11, 6  ;;  %v113_v23 = vld [vmem:[#allocation5 + $0x58] sm:$0xff]  ;;  %v114_v26 = vld [vmem:[#allocation5 + $0x60] sm:$0xff] }
  0x5f   :  { %194 = vperm.xlu0 %1915, %v192_v13   ;;  %v2267_v21 = vpack.c.bf16 %v111_v19, %v110_v18  ;;  %v678_v24 = vsel %vm677_vm4, 1, %v2085_v2  ;;  %vm758_vm5 = vcmp.gt.s32.totalorder %v2245_v11, 7  ;;  %v2275_v25 = vpack.c.bf16 %v113_v23, %v112_v22  ;;  %v115_v27 = vld [vmem:[#allocation5 + $0x68] sm:$0xff]  ;;  %v116_v30 = vld [vmem:[#allocation5 + $0x70] sm:$0xff]  ;;  %v117_v31 = vld [vmem:[#allocation5 + $0x78] sm:$0xff]  ;;  %p2052_p1 = por %p2051_p0, %p2050_p13 }
  0x60   :  { %v759_v28 = vsel %vm758_vm5, 1, %v2085_v2  ;;  %v2282_v29 = vpack.c.bf16 %v115_v27, %v114_v26  ;;  %v2288_v32 = vpack.c.bf16 %v117_v31, %v116_v30  ;;  %v118_v33 = vld [vmem:[#allocation2] sm:$0xff]  ;;  %vm353_vm7 = vcmp.gt.s32.totalorder %v2245_v11, 2  ;;  %v199_v43 = vld [vmem:[#allocation2 + $0x8] sm:$0xff]  ;;  %v280_v50 = vld [vmem:[#allocation2 + $0x10] sm:$0xff] }
  0x61   :  { %1644 = vmatpush3.bf16.msra.mxu0 %v2237_v8  ;;  %1668 = vmatpush3.bf16.msra.mxu1 %v2237_v8  ;;  %vm434_vm8 = vcmp.gt.s32.totalorder %v2245_v11, 3  ;;  %v354_v40 = vsel %vm353_vm7, 1, %v2085_v2  ;;  %vm596_vm9 = vcmp.gt.s32.totalorder %v2245_v11, 5  ;;  %v361_v57 = vld [vmem:[#allocation2 + $0x18] sm:$0xff]  ;;  %v766_v13 = vld [vmem:[#allocation10] sm:$0xff]  ;;  %v767_v14 = vld [vmem:[#allocation10 + $0x8] sm:$0xff]  ;;  %p2053_p2 = pnand %p2052_p1, %p2046_p12 }
  0x62   :  { %1645 = vmatprep.subr.bf16.mxu0 %v2082_v0  ;;  %1669 = vmatprep.subr.bf16.mxu1 %v2082_v0  ;;  %v435_v41 = vsel %vm434_vm8, 1, %v2085_v2  ;;  %v597_v42 = vsel %vm596_vm9, 1, %v2085_v2  ;;  %v442_v2 = vld [vmem:[#allocation2 + $0x20] sm:$0xff]  ;;  %v768_v18 = vld [vmem:[#allocation10 + $0x10] sm:$0xff]  ;;  %v769_v19 = vld [vmem:[#allocation10 + $0x18] sm:$0xff] }
  0x63   :  { %275 = vperm.xlu0 %1915, %v273_v16   ;;  %356 = vperm.xlu1 %1916, %v354_v40   ;;  %v1832_v16 = vpack.c.bf16 %v767_v14, %v766_v13  ;;  %v770_v22 = vld [vmem:[#allocation10 + $0x20] sm:$0xff]  ;;  %v771_v23 = vld [vmem:[#allocation10 + $0x28] sm:$0xff]  ;;  %v773_v26 = vld [vmem:[#allocation10 + $0x38] sm:$0xff] }
  0x64   :  { %v776_v31 = vld [vmem:[#allocation10 + $0x50] sm:$0xff]  ;;  %v865_v14 = vld [vmem:[#allocation7 + $0x40] sm:$0xff] }
  0x65   :  { %1647 = vmatpush3.bf16.msra.mxu0 %v2250_v12  ;;  %1671 = vmatpush3.bf16.msra.mxu1 %v2250_v12 }
  0x66   :  { %1648 = vmatprep.subr.bf16.mxu0 %v2082_v0  ;;  %1672 = vmatprep.subr.bf16.mxu1 %v2082_v0 }
  0x67   :  { %518 = vperm.xlu0 %1915, %v516_v20   ;;  %437 = vperm.xlu1 %1916, %v435_v41   ;;  %v857_v41 = vld [vmem:[#allocation7] sm:$0xff] }
  0x69   :  { %1650 = vmatpush3.bf16.msra.mxu0 %v2259_v17  ;;  %1674 = vmatpush3.bf16.msra.mxu1 %v2259_v17 }
  0x6a   :  { %1651 = vmatprep.subr.bf16.mxu0 %v2082_v0  ;;  %1675 = vmatprep.subr.bf16.mxu1 %v2082_v0 }
  0x6b   :  { %680 = vperm.xlu0 %1915, %v678_v24   ;;  %599 = vperm.xlu1 %1916, %v597_v42   ;;  %v1838_v24 = vpack.c.bf16 %v771_v23, %v770_v22  ;;  %v858_v42 = vld [vmem:[#allocation7 + $0x8] sm:$0xff]  ;;  %v885_v23 = vld [vmem:[#allocation8 + $0x60] sm:$0xff] }
  0x6d   :  { %1653 = vmatpush3.bf16.msra.mxu0 %v2267_v21  ;;  %1677 = vmatpush3.bf16.msra.mxu1 %v2267_v21 }
  0x6e   :  { %1654 = vmatprep.subr.bf16.mxu0 %v2082_v0  ;;  %1678 = vmatprep.subr.bf16.mxu1 %v2082_v0 }
  0x6f   :  { %761 = vperm.xlu0 %1915, %v759_v28   ;;  %v774_v28 = vld [vmem:[#allocation10 + $0x40] sm:$0xff] }
  0x71   :  { %1656 = vmatpush3.bf16.msra.mxu0 %v2275_v25  ;;  %1680 = vmatpush3.bf16.msra.mxu1 %v2275_v25 }
  0x72   :  { %1657 = vmatprep.subr.bf16.mxu0 %v2082_v0  ;;  %1681 = vmatprep.subr.bf16.mxu1 %v2082_v0 }
  0x75   :  { %1659 = vmatpush3.bf16.msra.mxu0 %v2282_v29  ;;  %1683 = vmatpush3.bf16.msra.mxu1 %v2282_v29 }
  0x76   :  { %1660 = vmatprep.subr.bf16.mxu0 %v2082_v0  ;;  %1684 = vmatprep.subr.bf16.mxu1 %v2082_v0 }
  0x79   :  { %1662 = vmatpush3.bf16.msra.mxu0 %v2288_v32  ;;  %1686 = vmatpush3.bf16.msra.mxu1 %v2288_v32 }
  0x7a   :  { %1687 = vmatprep.subr.bf16.mxu0 %v2082_v0  ;;  %1711 = vmatprep.subr.bf16.mxu1 %v2082_v0 }
  0x7c   :  { %1287 = vmatmul.mubr.f32.vlgmr.msra.gmra.mrb[0].mxu0 %v2084_v1 }
  0x7d   :  { %1689 = vmatpush3.bf16.msra.mxu0 %v2234_v6  ;;  %1356 = vmatprep.mubr.msk.f32.mxu0 %vm2083_vm0, %v2084_v1 }
  0x7e   :  { %1690 = vmatprep.subr.bf16.mxu0 %v2082_v0 }
  0x81   :  { %1692 = vmatpush3.bf16.msra.mxu0 %v2237_v8 }
  0x82   :  { %1693 = vmatprep.subr.bf16.mxu0 %v2082_v0 }
  0x85   :  { %1695 = vmatpush3.bf16.msra.mxu0 %v2250_v12 }
  0x86   :  { %1696 = vmatprep.subr.bf16.mxu0 %v2082_v0 }
  0x89   :  { %1698 = vmatpush3.bf16.msra.mxu0 %v2259_v17 }
  0x8a   :  { %1699 = vmatprep.subr.bf16.mxu0 %v2082_v0 }
  0x8d   :  { %1701 = vmatpush3.bf16.msra.mxu0 %v2267_v21 }
  0x8e   :  { %1702 = vmatprep.subr.bf16.mxu0 %v2082_v0 }
  0x91   :  { %1704 = vmatpush3.bf16.msra.mxu0 %v2275_v25 }
  0x92   :  { %1705 = vmatprep.subr.bf16.mxu0 %v2082_v0 }
  0x95   :  { %1707 = vmatpush3.bf16.msra.mxu0 %v2282_v29 }
  0x96   :  { %1708 = vmatprep.subr.bf16.mxu0 %v2082_v0 }
  0x99   :  { %1710 = vmatpush3.bf16.msra.mxu0 %v2288_v32 }
  0x9a   :  { %1735 = vmatprep.subr.bf16.mxu0 %v2082_v0 }
  0xde   :  { %v195_v37 = vpop.permute.xlu0 %194 }
  0xdf   :  { %vm196_vm6 = vcmp.eq.s32.totalorder %v195_v37, 1  ;;  %v780_v37 = vld [vmem:[#allocation10 + $0x70] sm:$0xff] }
  0xe2   :  { %v276_v47 = vpop.permute.xlu0 %275  ;;  %v357_v54 = vpop.permute.xlu1 %356 }
  0xe3   :  { %vm277_vm10 = vcmp.eq.s32.totalorder %v276_v47, 1  ;;  %vm358_vm11 = vcmp.eq.s32.totalorder %v357_v54, 1  ;;  %v861_v47 = vld [vmem:[#allocation7 + $0x20] sm:$0xff] }
  0xe6   :  { %v438_v61 = vpop.permute.xlu1 %437  ;;  %v519_v7 = vpop.permute.xlu0 %518 }
  0xe7   :  { %vm439_vm12 = vcmp.eq.s32.totalorder %v438_v61, 1  ;;  %vm520_vm13 = vcmp.eq.s32.totalorder %v519_v7, 1 }
  0xea   :  { %v600_v15 = vpop.permute.xlu1 %599 }
  0xeb   :  { %vm601_vm14 = vcmp.eq.s32.totalorder %v600_v15, 1  ;;  %v866_v15 = vld [vmem:[#allocation7 + $0x48] sm:$0xff] }
 0x14f   :  { %v185_v34 = vpop.f32.mrb[0].mxu0 }
 0x150   :  { %v189_v35 = vadd.f32 %v185_v34, %v118_v33  ;;  %v1288_v36 = vpop.f32.mrb[1].mxu0  ;;  %v778_v34 = vld [vmem:[#allocation10 + $0x60] sm:$0xff] }
 0x152   :  { %1917 = vtanh.f32 %v189_v35  ;;  %v779_v35 = vld [vmem:[#allocation10 + $0x68] sm:$0xff] }
 0x153   :  { %v1850_v36 = vpack.c.bf16 %v779_v35, %v778_v34 }
 0x15c   :  { %v1918_v38 = vpop.eup %1917 }
 0x15d   :  { %1322 = vmatmul.mubr.msk.f32.vlgmr.msra.gmra.mrb[0].mxu1 %vm196_vm6, %v1918_v38  ;;  %v197_v39 = vsel %vm196_vm6, %v1918_v38, 0.0  ;;  %v781_v38 = vld [vmem:[#allocation10 + $0x78] sm:$0xff] }
 0x15e   :  { %1713 = vmatpush3.bf16.msra.mxu1 %v2234_v6  ;;  %1391 = vmatprep.mubr.msk.f32.mxu1 %vm2083_vm0, %v2084_v1  ;;  %v1853_v40 = vpack.c.bf16 %v781_v38, %v780_v37 }
 0x15f   :  { %1714 = vmatprep.subr.bf16.mxu1 %v2082_v0 }
 0x162   :  { %1716 = vmatpush3.bf16.msra.mxu1 %v2237_v8 }
 0x163   :  { %1717 = vmatprep.subr.bf16.mxu1 %v2082_v0 }
 0x166   :  { %1719 = vmatpush3.bf16.msra.mxu1 %v2250_v12 }
 0x167   :  { %1720 = vmatprep.subr.bf16.mxu1 %v2082_v0 }
 0x16a   :  { %1722 = vmatpush3.bf16.msra.mxu1 %v2259_v17 }
 0x16b   :  { %1723 = vmatprep.subr.bf16.mxu1 %v2082_v0 }
 0x16e   :  { %1725 = vmatpush3.bf16.msra.mxu1 %v2267_v21 }
 0x16f   :  { %1726 = vmatprep.subr.bf16.mxu1 %v2082_v0 }
 0x172   :  { %1728 = vmatpush3.bf16.msra.mxu1 %v2275_v25 }
 0x173   :  { %1729 = vmatprep.subr.bf16.mxu1 %v2082_v0 }
 0x176   :  { %1731 = vmatpush3.bf16.msra.mxu1 %v2282_v29 }
 0x177   :  { %1732 = vmatprep.subr.bf16.mxu1 %v2082_v0 }
 0x17a   :  { %1734 = vmatpush3.bf16.msra.mxu1 %v2288_v32 }
 0x17b   :  { %1759 = vmatprep.subr.bf16.mxu1 %v2082_v0 }
 0x230   :  { %v266_v44 = vpop.f32.mrb[0].mxu1 }
 0x231   :  { %v270_v45 = vadd.f32 %v266_v44, %v199_v43  ;;  %v1323_v46 = vpop.f32.mrb[1].mxu1  ;;  %v1880_v43 = vpack.c.bf16 %v858_v42, %v857_v41  ;;  %v859_v44 = vld [vmem:[#allocation7 + $0x10] sm:$0xff] }
 0x233   :  { %1919 = vtanh.f32 %v270_v45  ;;  %v860_v45 = vld [vmem:[#allocation7 + $0x18] sm:$0xff] }
 0x234   :  { %v1883_v46 = vpack.c.bf16 %v860_v45, %v859_v44 }
 0x23d   :  { %v1920_v48 = vpop.eup %1919 }
 0x23e   :  { %v278_v49 = vsel %vm277_vm10, %v1920_v48, %v197_v39  ;;  %v2426_v39 = vld [vmem:[%s2482_s8] sm:$0xff]  ;;  %v862_v48 = vld [vmem:[#allocation7 + $0x28] sm:$0xff] }
 0x23f   :  { %1357 = vmatmul.mubr.f32.vlgmr.msra.gmra.mrb[2].mxu0 %v278_v49  ;;  %852 = vadd.xlane.f32.xlu1 %v2426_v39 }
 0x240   :  { %1737 = vmatpush3.bf16.msra.mxu0 %v2234_v6  ;;  %1426 = vmatprep.mubr.msk.f32.mxu0 %vm2083_vm0, %v2084_v1 }
 0x241   :  { %1738 = vmatprep.subr.bf16.mxu0 %v2082_v0 }
 0x244   :  { %1740 = vmatpush3.bf16.msra.mxu0 %v2237_v8 }
 0x245   :  { %1741 = vmatprep.subr.bf16.mxu0 %v2082_v0 }
 0x248   :  { %1743 = vmatpush3.bf16.msra.mxu0 %v2250_v12 }
 0x249   :  { %1744 = vmatprep.subr.bf16.mxu0 %v2082_v0 }
 0x24c   :  { %1746 = vmatpush3.bf16.msra.mxu0 %v2259_v17 }
 0x24d   :  { %1747 = vmatprep.subr.bf16.mxu0 %v2082_v0 }
 0x250   :  { %1749 = vmatpush3.bf16.msra.mxu0 %v2267_v21 }
 0x251   :  { %1750 = vmatprep.subr.bf16.mxu0 %v2082_v0 }
 0x254   :  { %1752 = vmatpush3.bf16.msra.mxu0 %v2275_v25 }
 0x255   :  { %1753 = vmatprep.subr.bf16.mxu0 %v2082_v0 }
 0x258   :  { %1755 = vmatpush3.bf16.msra.mxu0 %v2282_v29 }
 0x259   :  { %1756 = vmatprep.subr.bf16.mxu0 %v2082_v0 }
 0x25c   :  { %1758 = vmatpush3.bf16.msra.mxu0 %v2288_v32 }
 0x25d   :  { %1783 = vmatprep.subr.bf16.mxu0 %v2082_v0 }
 0x312   :  { %v347_v51 = vpop.f32.mrb[2].mxu0 }
 0x313   :  { %v351_v52 = vadd.f32 %v347_v51, %v280_v50  ;;  %v1358_v53 = vpop.f32.mrb[3].mxu0  ;;  %v863_v50 = vld [vmem:[#allocation7 + $0x30] sm:$0xff]  ;;  %v864_v51 = vld [vmem:[#allocation7 + $0x38] sm:$0xff] }
 0x314   :  { %v604_v53 = vld [vmem:[#allocation2 + $0x30] sm:$0xff] }
 0x315   :  { %1921 = vtanh.f32 %v351_v52  ;;  %v1889_v52 = vpack.c.bf16 %v864_v51, %v863_v50  ;;  %v1065_v50 = vld [vmem:[%s2479_s5] ss:$0 sm:$0xff] }
 0x31f   :  { %v1922_v55 = vpop.eup %1921 }
 0x320   :  { %v359_v56 = vsel %vm358_vm11, %v1922_v55, %v278_v49  ;;  %v1886_v49 = vpack.c.bf16 %v862_v48, %v861_v47 }
 0x321   :  { %1392 = vmatmul.mubr.f32.vlgmr.msra.gmra.mrb[2].mxu1 %v359_v56 }
 0x322   :  { %1761 = vmatpush3.bf16.msra.mxu1 %v2234_v6  ;;  %1461 = vmatprep.mubr.msk.f32.mxu1 %vm2083_vm0, %v2084_v1 }
 0x323   :  { %1762 = vmatprep.subr.bf16.mxu1 %v2082_v0 }
 0x326   :  { %1764 = vmatpush3.bf16.msra.mxu1 %v2237_v8 }
 0x327   :  { %1765 = vmatprep.subr.bf16.mxu1 %v2082_v0 }
 0x32a   :  { %1767 = vmatpush3.bf16.msra.mxu1 %v2250_v12 }
 0x32b   :  { %1768 = vmatprep.subr.bf16.mxu1 %v2082_v0 }
 0x32e   :  { %1770 = vmatpush3.bf16.msra.mxu1 %v2259_v17 }
 0x32f   :  { %1771 = vmatprep.subr.bf16.mxu1 %v2082_v0 }
 0x332   :  { %1773 = vmatpush3.bf16.msra.mxu1 %v2267_v21 }
 0x333   :  { %1774 = vmatprep.subr.bf16.mxu1 %v2082_v0 }
 0x336   :  { %1776 = vmatpush3.bf16.msra.mxu1 %v2275_v25 }
 0x337   :  { %1777 = vmatprep.subr.bf16.mxu1 %v2082_v0 }
 0x33a   :  { %1779 = vmatpush3.bf16.msra.mxu1 %v2282_v29 }
 0x33b   :  { %1780 = vmatprep.subr.bf16.mxu1 %v2082_v0 }
 0x33e   :  { %1782 = vmatpush3.bf16.msra.mxu1 %v2288_v32 }
 0x33f   :  { %1807 = vmatprep.subr.bf16.mxu1 %v2082_v0 }
 0x3f4   :  { %v428_v58 = vpop.f32.mrb[2].mxu1 }
 0x3f5   :  { %v432_v59 = vadd.f32 %v428_v58, %v361_v57  ;;  %v1393_v60 = vpop.f32.mrb[3].mxu1  ;;  %v873_v57 = vld [vmem:[#allocation8] sm:$0xff]  ;;  %v874_v58 = vld [vmem:[#allocation8 + $0x8] sm:$0xff] }
 0x3f6   :  { %v1856_v60 = vpack.c.bf16 %v874_v58, %v873_v57 }
 0x3f7   :  { %1923 = vtanh.f32 %v432_v59  ;;  %v681_v59 = vpop.permute.xlu0 %680 }
 0x3f8   :  { %vm682_vm15 = vcmp.eq.s32.totalorder %v681_v59, 1 }
 0x3fb   :  { %v762_v44 = vpop.permute.xlu0 %761 }
 0x401   :  { %v1924_v62 = vpop.eup %1923 }
 0x402   :  { %v440_v63 = vsel %vm439_vm12, %v1924_v62, %v359_v56  ;;  %v875_v62 = vld [vmem:[#allocation8 + $0x10] sm:$0xff] }
 0x403   :  { %1427 = vmatmul.mubr.f32.vlgmr.msra.gmra.mrb[4].mxu0 %v440_v63 }
 0x404   :  { %1785 = vmatpush3.bf16.msra.mxu0 %v2234_v6  ;;  %1496 = vmatprep.mubr.msk.f32.mxu0 %vm2083_vm0, %v2084_v1 }
 0x405   :  { %1786 = vmatprep.subr.bf16.mxu0 %v2082_v0 }
 0x408   :  { %1788 = vmatpush3.bf16.msra.mxu0 %v2237_v8 }
 0x409   :  { %1789 = vmatprep.subr.bf16.mxu0 %v2082_v0 }
 0x40c   :  { %1791 = vmatpush3.bf16.msra.mxu0 %v2250_v12 }
 0x40d   :  { %1792 = vmatprep.subr.bf16.mxu0 %v2082_v0 }
 0x410   :  { %1794 = vmatpush3.bf16.msra.mxu0 %v2259_v17 }
 0x411   :  { %1795 = vmatprep.subr.bf16.mxu0 %v2082_v0 }
 0x414   :  { %1797 = vmatpush3.bf16.msra.mxu0 %v2267_v21 }
 0x415   :  { %1798 = vmatprep.subr.bf16.mxu0 %v2082_v0 }
 0x418   :  { %1800 = vmatpush3.bf16.msra.mxu0 %v2275_v25 }
 0x419   :  { %1801 = vmatprep.subr.bf16.mxu0 %v2082_v0 }
 0x41c   :  { %1803 = vmatpush3.bf16.msra.mxu0 %v2282_v29 }
 0x41d   :  { %1804 = vmatprep.subr.bf16.mxu0 %v2082_v0 }
 0x420   :  { %1806 = vmatpush3.bf16.msra.mxu0 %v2288_v32 }
 0x421   :  { %1831 = vmatprep.subr.bf16.mxu0 %v2082_v0 }
 0x4d6   :  { %v509_v3 = vpop.f32.mrb[4].mxu0 }
 0x4d7   :  { %v513_v4 = vadd.f32 %v509_v3, %v442_v2  ;;  %v1428_v5 = vpop.f32.mrb[5].mxu0 }
 0x4d8   :  { %v878_v5 = vld [vmem:[#allocation8 + $0x28] sm:$0xff] }
 0x4d9   :  { %1925 = vtanh.f32 %v513_v4  ;;  %v877_v4 = vld [vmem:[#allocation8 + $0x20] sm:$0xff] }
 0x4da   :  { %v1862_v7 = vpack.c.bf16 %v878_v5, %v877_v4 }
 0x4e3   :  { %v1926_v9 = vpop.eup %1925 }
 0x4e4   :  { %v521_v10 = vsel %vm520_vm13, %v1926_v9, %v440_v63  ;;  %v876_v63 = vld [vmem:[#allocation8 + $0x18] sm:$0xff]  ;;  %v879_v9 = vld [vmem:[#allocation8 + $0x30] sm:$0xff] }
 0x4e5   :  { %1462 = vmatmul.mubr.f32.vlgmr.msra.gmra.mrb[4].mxu1 %v521_v10  ;;  %v1859_v3 = vpack.c.bf16 %v876_v63, %v875_v62 }
 0x4e6   :  { %1809 = vmatpush3.bf16.msra.mxu1 %v2234_v6  ;;  %1531 = vmatprep.mubr.msk.f32.mxu1 %vm2083_vm0, %v2084_v1  ;;  %v523_v6 = vld [vmem:[#allocation2 + $0x28] sm:$0xff] }
 0x4e7   :  { %1810 = vmatprep.subr.bf16.mxu1 %v2082_v0 }
 0x4ea   :  { %1812 = vmatpush3.bf16.msra.mxu1 %v2237_v8 }
 0x4eb   :  { %1813 = vmatprep.subr.bf16.mxu1 %v2082_v0 }
 0x4ee   :  { %1815 = vmatpush3.bf16.msra.mxu1 %v2250_v12 }
 0x4ef   :  { %1816 = vmatprep.subr.bf16.mxu1 %v2082_v0 }
 0x4f2   :  { %1818 = vmatpush3.bf16.msra.mxu1 %v2259_v17 }
 0x4f3   :  { %1819 = vmatprep.subr.bf16.mxu1 %v2082_v0 }
 0x4f6   :  { %1821 = vmatpush3.bf16.msra.mxu1 %v2267_v21  ;;  %v1835_v21 = vpack.c.bf16 %v769_v19, %v768_v18  ;;  %v884_v18 = vld [vmem:[#allocation8 + $0x58] sm:$0xff] }
 0x4f7   :  { %1822 = vmatprep.subr.bf16.mxu1 %v2082_v0 }
 0x4fa   :  { %1824 = vmatpush3.bf16.msra.mxu1 %v2275_v25  ;;  %v772_v25 = vld [vmem:[#allocation10 + $0x30] sm:$0xff] }
 0x4fb   :  { %1825 = vmatprep.subr.bf16.mxu1 %v2082_v0  ;;  %v1841_v27 = vpack.c.bf16 %v773_v26, %v772_v25  ;;  %v869_v25 = vld [vmem:[#allocation7 + $0x60] sm:$0xff] }
 0x4fe   :  { %1827 = vmatpush3.bf16.msra.mxu1 %v2282_v29  ;;  %v775_v29 = vld [vmem:[#allocation10 + $0x48] sm:$0xff] }
 0x4ff   :  { %1828 = vmatprep.subr.bf16.mxu1 %v2082_v0  ;;  %v1844_v30 = vpack.c.bf16 %v775_v29, %v774_v28  ;;  %v887_v28 = vld [vmem:[#allocation8 + $0x70] sm:$0xff]  ;;  %v888_v29 = vld [vmem:[#allocation8 + $0x78] sm:$0xff] }
 0x502   :  { %1830 = vmatpush3.bf16.msra.mxu1 %v2288_v32  ;;  %v777_v32 = vld [vmem:[#allocation10 + $0x58] sm:$0xff] }
 0x503   :  { %1855 = vmatprep.subr.bf16.mxu1 %v2082_v0  ;;  %v1847_v33 = vpack.c.bf16 %v777_v32, %v776_v31  ;;  %v871_v31 = vld [vmem:[#allocation7 + $0x70] sm:$0xff]  ;;  %v872_v32 = vld [vmem:[#allocation7 + $0x78] sm:$0xff] }
 0x504   :  { %v1901_v34 = vpack.c.bf16 %v872_v32, %v871_v31 }
 0x5b8   :  { %v590_v8 = vpop.f32.mrb[4].mxu1 }
 0x5b9   :  { %v594_v11 = vadd.f32 %v590_v8, %v523_v6  ;;  %v1463_v12 = vpop.f32.mrb[5].mxu1  ;;  %v881_v8 = vld [vmem:[#allocation8 + $0x40] sm:$0xff] }
 0x5bb   :  { %1927 = vtanh.f32 %v594_v11  ;;  %v882_v11 = vld [vmem:[#allocation8 + $0x48] sm:$0xff] }
 0x5bc   :  { %v1868_v12 = vpack.c.bf16 %v882_v11, %v881_v8 }
 0x5c5   :  { %v1928_v17 = vpop.eup %1927 }
 0x5c6   :  { %v2412_v20 = vsel %vm601_vm14, %v1928_v17, %v521_v10  ;;  %v880_v10 = vld [vmem:[#allocation8 + $0x38] sm:$0xff]  ;;  %v883_v17 = vld [vmem:[#allocation8 + $0x50] sm:$0xff] }
 0x5c7   :  { %1497 = vmatmul.mubr.f32.vlgmr.msra.gmra.mrb[6].mxu0 %v2412_v20  ;;  %v1865_v6 = vpack.c.bf16 %v880_v10, %v879_v9  ;;  %v1871_v19 = vpack.c.bf16 %v884_v18, %v883_v17 }
 0x5c8   :  { %1833 = vmatpush3.bf16.msra.mxu0 %v1832_v16  ;;  %1566 = vmatprep.mubr.msk.f32.mxu0 %vm2083_vm0, %v2084_v1  ;;  %v1892_v16 = vpack.c.bf16 %v866_v15, %v865_v14 }
 0x5c9   :  { %1834 = vmatprep.subr.bf16.mxu0 %v2082_v0 }
 0x5cc   :  { %1836 = vmatpush3.bf16.msra.mxu0 %v1835_v21  ;;  %v868_v21 = vld [vmem:[#allocation7 + $0x58] sm:$0xff] }
 0x5cd   :  { %1837 = vmatprep.subr.bf16.mxu0 %v2082_v0 }
 0x5d0   :  { %1839 = vmatpush3.bf16.msra.mxu0 %v1838_v24  ;;  %v886_v24 = vld [vmem:[#allocation8 + $0x68] sm:$0xff] }
 0x5d1   :  { %1840 = vmatprep.subr.bf16.mxu0 %v2082_v0  ;;  %v1874_v26 = vpack.c.bf16 %v886_v24, %v885_v23 }
 0x5d4   :  { %1842 = vmatpush3.bf16.msra.mxu0 %v1841_v27  ;;  %v870_v27 = vld [vmem:[#allocation7 + $0x68] sm:$0xff] }
 0x5d5   :  { %1843 = vmatprep.subr.bf16.mxu0 %v2082_v0 }
 0x5d8   :  { %1845 = vmatpush3.bf16.msra.mxu0 %v1844_v30  ;;  %v1898_v30 = vpack.c.bf16 %v870_v27, %v869_v25 }
 0x5d9   :  { %1846 = vmatprep.subr.bf16.mxu0 %v2082_v0 }
 0x5dc   :  { %1848 = vmatpush3.bf16.msra.mxu0 %v1847_v33  ;;  %v1877_v33 = vpack.c.bf16 %v888_v29, %v887_v28 }
 0x5dd   :  { %1849 = vmatprep.subr.bf16.mxu0 %v2082_v0 }
 0x5e0   :  { %1851 = vmatpush3.bf16.msra.mxu0 %v1850_v36 }
 0x5e1   :  { %1852 = vmatprep.subr.bf16.mxu0 %v2082_v0 }
 0x5e4   :  { %1854 = vmatpush3.bf16.msra.mxu0 %v1853_v40  ;;  %v685_v40 = vld [vmem:[#allocation2 + $0x38] sm:$0xff] }
 0x5e5   :  { %1879 = vmatprep.subr.bf16.mxu0 %v2082_v0 }
 0x5e7   :  { %1567 = vmatmul.mubr.f32.vlgmr.msra.gmra.mrb[8].mxu0 %v2426_v39 }
 0x5e8   :  { %1881 = vmatpush3.bf16.msra.mxu0 %v1880_v43  ;;  %1636 = vmatprep.mubr.msk.f32.mxu0 %vm2083_vm0, %v2084_v1 }
 0x5e9   :  { %1882 = vmatprep.subr.bf16.mxu0 %v2082_v0 }
 0x5ec   :  { %1884 = vmatpush3.bf16.msra.mxu0 %v1883_v46 }
 0x5ed   :  { %1885 = vmatprep.subr.bf16.mxu0 %v2082_v0 }
 0x5f0   :  { %1887 = vmatpush3.bf16.msra.mxu0 %v1886_v49 }
 0x5f1   :  { %1888 = vmatprep.subr.bf16.mxu0 %v2082_v0 }
 0x5f4   :  { %1890 = vmatpush3.bf16.msra.mxu0 %v1889_v52 }
 0x5f5   :  { %1891 = vmatprep.subr.bf16.mxu0 %v2082_v0 }
 0x5f8   :  { %1893 = vmatpush3.bf16.msra.mxu0 %v1892_v16 }
 0x5f9   :  { %1894 = vmatprep.subr.bf16.mxu0 %v2082_v0 }
 0x69a   :  { %v671_v54 = vpop.f32.mrb[6].mxu0 }
 0x69b   :  { %v675_v55 = vadd.f32 %v671_v54, %v604_v53  ;;  %v1498_v56 = vpop.f32.mrb[7].mxu0 }
 0x69d   :  { %1929 = vtanh.f32 %v675_v55 }
 0x6a7   :  { %v1930_v61 = vpop.eup %1929 }
 0x6a8   :  { %v2439_v2 = vsel %vm682_vm15, %v1930_v61, %v2412_v20  ;;  %v867_v20 = vld [vmem:[#allocation7 + $0x50] sm:$0xff] }
 0x6a9   :  { %1532 = vmatmul.mubr.f32.vlgmr.msra.gmra.mrb[6].mxu1 %v2439_v2  ;;  %v1895_v22 = vpack.c.bf16 %v868_v21, %v867_v20 }
 0x6aa   :  { %1857 = vmatpush3.bf16.msra.mxu1 %v1856_v60  ;;  %1601 = vmatprep.mubr.msk.f32.mxu1 %vm2083_vm0, %v2084_v1  ;;  %v853_v1 = vpop.xlane.xlu1 %852  ;;  %vm763_vm0 = vcmp.eq.s32.totalorder %v762_v44, 1 }
 0x6ab   :  { %1858 = vmatprep.subr.bf16.mxu1 %v2082_v0  ;;  %v854_v13 = vmax.f32 %v853_v1, 0.5  ;;  %1896 = vmatpush3.bf16.msra.mxu0 %v1895_v22 }
 0x6ac   :  { %1897 = vmatprep.subr.bf16.mxu0 %v2082_v0 }
 0x6ad   :  { %1931 = vrcp.f32 %v854_v13 }
 0x6ae   :  { %1860 = vmatpush3.bf16.msra.mxu1 %v1859_v3 }
 0x6af   :  { %1861 = vmatprep.subr.bf16.mxu1 %v2082_v0  ;;  %1899 = vmatpush3.bf16.msra.mxu0 %v1898_v30 }
 0x6b0   :  { %1900 = vmatprep.subr.bf16.mxu0 %v2082_v0 }
 0x6b2   :  { %1863 = vmatpush3.bf16.msra.mxu1 %v1862_v7 }
 0x6b3   :  { %1864 = vmatprep.subr.bf16.mxu1 %v2082_v0  ;;  %1902 = vmatpush3.bf16.msra.mxu0 %v1901_v34 }
 0x6b6   :  { %1866 = vmatpush3.bf16.msra.mxu1 %v1865_v6 }
 0x6b7   :  { %1867 = vmatprep.subr.bf16.mxu1 %v2082_v0  ;;  %v1932_v35 = vpop.eup %1931 }
 0x6ba   :  { %1869 = vmatpush3.bf16.msra.mxu1 %v1868_v12  ;;  %v848_v36 = vpop.f32.mrb[8].mxu0 }
 0x6bb   :  { %1870 = vmatprep.subr.bf16.mxu1 %v2082_v0  ;;  %v856_v37 = vmul.f32 %v1932_v35, %v848_v36  ;;  %v1568_v38 = vpop.f32.mrb[9].mxu0 }
 0x6be   :  { %1872 = vmatpush3.bf16.msra.mxu1 %v1871_v19 }
 0x6bf   :  { %1873 = vmatprep.subr.bf16.mxu1 %v2082_v0 }
 0x6c2   :  { %1875 = vmatpush3.bf16.msra.mxu1 %v1874_v26 }
 0x6c3   :  { %1876 = vmatprep.subr.bf16.mxu1 %v2082_v0  ;;  %v1066_v0 = vld [vmem:[%s2481_s7] ss:$0 sm:$0xff] }
 0x6c4   :  { %v1044_v53 = vmul.f32 %v1066_v0, %v2426_v39 }
 0x6c6   :  { %1878 = vmatpush3.bf16.msra.mxu1 %v1877_v33 }
 0x6c9   :  { %1602 = vmatmul.mubr.f32.vlgmr.msra.gmra.mrb[8].mxu1 %v856_v37 }
 0x77c   :  { %v752_v41 = vpop.f32.mrb[6].mxu1 }
 0x77d   :  { %v756_v42 = vadd.f32 %v752_v41, %v685_v40  ;;  %v1533_v43 = vpop.f32.mrb[7].mxu1 }
 0x77f   :  { %1933 = vtanh.f32 %v756_v42 }
 0x789   :  { %v1934_v45 = vpop.eup %1933 }
 0x78a   :  { %v764_v46 = vsel %vm763_vm0, %v1934_v45, %v2439_v2 }
 0x78b   :  { %1637 = vmatmul.mubr.f32.vlgmr.msra.gmra.mrb[10].mxu0 %v764_v46 }
 0x79c   :  { %v955_v47 = vpop.f32.mrb[8].mxu1 }
 0x79d   :  { %v1603_v48 = vpop.f32.mrb[9].mxu1 }
 0x85e   :  { %v1025_v49 = vpop.f32.mrb[10].mxu0 }
 0x85f   :  { %v1026_v51 = vadd.f32 %v1025_v49, %v955_v47  ;;  %v1638_v52 = vpop.f32.mrb[11].mxu0 }
 0x861   :  { %v1036_v54 = vadd.f32 %v1065_v50, %v1026_v51 }
 0x863   :  { %v1045_v55 = vadd.f32 %v1044_v53, %v1036_v54 }
 0x865   :  { %1046 = vst [vmem:[#allocation11] sm:$0xff] %v1045_v55 }
 0x866   :  { %2056 = shalt.err (!%p2053_p2)
}
 0x867   :  { %s2057_s5 = scalar_lea.hbm %s2483_s9, 128 }
 0x868   :  { %p2058_p3 = scmp.ne.s32.totalorder %s2483_s9, %s2057_s5  ;;  %p2061_p4 = scmp.lt.u32.totalorder %s2057_s5, %s2483_s9 }
 0x86a   :  { %p2063_p5 = pnand %p2061_p4, %p2058_p3 }
 0x86c   :  { %2066 = shalt.err (!%p2063_p5)
}
 0x86d   :  { %1056 = dma.vmem_to_hbm [thread:$0]  %s1054_s11, 128, %s2483_s9, [#allocation4]  }
 0x86e   :  { %2073 = dma.done.wait [#allocation4], 128  }
 0x86f   :  { %2074 = vsyncadd [#allocation4], 4294967168 }
 0x870   :  { %1060 = vsyncpa [#allocation3], 1 }
 0x871   :  { %1061 = vsyncpa [#allocation6], 1 }
 0x872   :  { %1062 = vsyncpa [#allocation9], 1 }
 0x873   :  { %1063 = vsyncpa [#allocation4], 1 }

</bundles_post_ra>
